<compile_context>
chip_gen: v5e
topology: v5e:2x2
jax: 0.10.0
libtpu: 0.0.40
codegen_flags: <defaults>
</compile_context>

<pallas_src>
import jax
import jax.numpy as jnp
from jax import lax
from jax.experimental import pallas as pl
from jax.experimental.pallas import tpu as pltpu

CANDIDATE_DIMS = (16, 32, 64)
NUM_BRANCHES = len(CANDIDATE_DIMS)
BN_EPS = 1e-5


def autodim_kernel(idx_ref,      # VMEM (B, 1)  int32   lookup ids
                   emb_ref,      # VMEM (N, KTOT)       concatenated raw tables
                   w_ref,        # VMEM (KTOT, nb*D)    block-diagonal Linear weights
                   gb_ref,       # VMEM (2, nb*D)       row0 = gamma, row1 = beta
                   wgt_ref,      # VMEM (N, nb*D)       softmax branch weights (broadcast over D)
                   out_ref):     # VMEM (B, D)          gathered output
    # ---- one fused MXU matmul: all three branch Linear transforms ----
    h = jnp.dot(emb_ref[...], w_ref[...],
                preferred_element_type=jnp.float32)              # (N, nb*D)

    # ---- BatchNorm1d (training mode): biased batch stats, per column ----
    mean = jnp.mean(h, axis=0, keepdims=True)                    # (1, nb*D)
    var = jnp.mean(jnp.square(h - mean), axis=0, keepdims=True)  # (1, nb*D)
    gamma = gb_ref[0:1, :]
    beta = gb_ref[1:2, :]
    hn = (h - mean) * lax.rsqrt(var + BN_EPS) * gamma + beta     # (N, nb*D)

    # ---- apply precomputed per-(branch, row) softmax weights ----
    weighted = hn * wgt_ref[...]                                 # (N, nb*D)

    # ---- sum the branch column-blocks -> all_emb (N, D) (pre-gather) ----
    d = out_ref.shape[1]
    nb = weighted.shape[1] // d
    all_emb = weighted[:, 0:d]
    for k in range(1, nb):                                       # static unroll (nb=3)
        all_emb = all_emb + weighted[:, k * d:(k + 1) * d]       # (N, D)

    # ---- gather looked-up rows via one-hot MXU matmul ----
    idx = idx_ref[...]                                           # (B, 1) int32
    b_sz = idx.shape[0]
    n_rows = all_emb.shape[0]
    onehot = (lax.broadcasted_iota(jnp.int32, (b_sz, n_rows), 1)
              == idx).astype(jnp.float32)                        # (B, N)
    out_ref[...] = jnp.dot(onehot, all_emb,
                           preferred_element_type=jnp.float32)   # (B, D)


@jax.jit
def autodim_embedding(x_idx, emb_cat, w_blk, gb_cat, alpha_kn):
    """x_idx (B,), emb_cat (N, KTOT), w_blk (KTOT, nb*D), gb_cat (2, nb*D), alpha_kn (nb, N)."""
    nb, _ = alpha_kn.shape
    d = w_blk.shape[1] // nb
    b_sz = x_idx.shape[0]

    # Precompute branch softmax once (trivial XLA fusion), lane-dense layout.
    sm = jax.nn.softmax(alpha_kn, axis=0)            # (nb, N)
    wgt = jnp.repeat(sm.T, d, axis=1)                # (N, nb*D); block k = branch k
    idx2d = x_idx.astype(jnp.int32).reshape(b_sz, 1)

    return pl.pallas_call(
        autodim_kernel,
        out_shape=jax.ShapeDtypeStruct((b_sz, d), jnp.float32),
        in_specs=[pl.BlockSpec(memory_space=pltpu.MemorySpace.VMEM)] * 5,
        out_specs=pl.BlockSpec(memory_space=pltpu.MemorySpace.VMEM),
    )(idx2d, emb_cat, w_blk, gb_cat, wgt)


def reference(x_idx, emb_list, w_list, b_list, g_list, beta_list, a_list):
    outs, alphas = [], []
    for e_i, w_i, b_i, g_i, be_i, a_i in zip(emb_list, w_list, b_list, g_list, beta_list, a_list):
        h = e_i @ w_i + b_i
        mean = h.mean(axis=0, keepdims=True)
        var = ((h - mean) ** 2).mean(axis=0, keepdims=True)
        hn = (h - mean) / jnp.sqrt(var + BN_EPS) * g_i + be_i
        outs.append(hn)
        alphas.append(a_i)
    outs = jnp.stack(outs)                       # (3, N, D)
    alphas = jnp.stack(alphas)                   # (3, N, 1)
    sm = jax.nn.softmax(alphas, axis=0)
    all_emb = (outs * sm).sum(axis=0)            # (N, D)
    return all_emb[x_idx]


if __name__ == "__main__":
    N = 64    # num_embeddings
    D = 32    # embedding_dim == config['latent_dim']
    B = 8     # number of lookup indices in x
    KTOT = sum(CANDIDATE_DIMS)                   # 112

    key = jax.random.PRNGKey(0)
    keys = jax.random.split(key, NUM_BRANCHES * 6 + 1)

    emb_list, w_list, b_list, g_list, beta_list, a_list = [], [], [], [], [], []
    kc = 0
    for d in CANDIDATE_DIMS:
        e_i = 0.5 * jax.random.normal(keys[kc], (N, d), jnp.float32); kc += 1
        w_i = jax.random.normal(keys[kc], (d, D), jnp.float32) / jnp.sqrt(float(d)); kc += 1
        b_i = 0.1 * jax.random.normal(keys[kc], (1, D), jnp.float32); kc += 1
        g_i = 1.0 + 0.1 * jax.random.normal(keys[kc], (1, D), jnp.float32); kc += 1
        be_i = 0.1 * jax.random.normal(keys[kc], (1, D), jnp.float32); kc += 1
        a_i = jax.random.normal(keys[kc], (N, 1), jnp.float32); kc += 1
        emb_list.append(e_i); w_list.append(w_i); b_list.append(b_i)
        g_list.append(g_i); beta_list.append(be_i); a_list.append(a_i)

    # --- pack parameters for the fused kernel ---
    emb_cat = jnp.concatenate(emb_list, axis=1)                    # (N, KTOT)
    w_blk = jnp.zeros((KTOT, NUM_BRANCHES * D), jnp.float32)       # block-diagonal
    off = 0
    for k, d in enumerate(CANDIDATE_DIMS):
        w_blk = w_blk.at[off:off + d, k * D:(k + 1) * D].set(w_list[k])
        off += d
    gb_cat = jnp.concatenate(
        [jnp.concatenate(g_list, axis=1), jnp.concatenate(beta_list, axis=1)], axis=0)  # (2, nb*D)
    alpha_kn = jnp.stack([a.reshape(-1) for a in a_list])          # (nb, N)
    # NOTE: Linear biases are intentionally omitted from the kernel — BN mean
    # subtraction cancels them exactly (reference keeps them to verify this).

    x_idx = jax.random.randint(keys[kc], (B,), 0, N, dtype=jnp.int32)

    out = autodim_embedding(x_idx, emb_cat, w_blk, gb_cat, alpha_kn)
    out = jax.block_until_ready(out)

    ref = reference(x_idx, emb_list, w_list, b_list, g_list, beta_list, a_list)
    assert out.shape == (B, D)
    assert jnp.allclose(out, ref, rtol=1e-3, atol=1e-3), (
        f"max abs diff {jnp.max(jnp.abs(out - ref))}")

    print("KERNEL_OK")
</pallas_src>

<mosaic_0001>
module attributes {stable_mosaic.version = 11 : i64} {
  func.func @autodim_kernel(%arg0: memref<8x1xi32, #tpu.memory_space<vmem>>, %arg1: memref<64x112xf32, #tpu.memory_space<vmem>>, %arg2: memref<112x96xf32, #tpu.memory_space<vmem>>, %arg3: memref<2x96xf32, #tpu.memory_space<vmem>>, %arg4: memref<64x96xf32, #tpu.memory_space<vmem>>, %arg5: memref<8x32xf32, #tpu.memory_space<vmem>>) attributes {dimension_semantics = [], scalar_prefetch = 0 : i64, scratch_operands = 0 : i64, tpu.core_type = #tpu.core_type<tc>} {
    %c0 = arith.constant 0 : index
    %c0_0 = arith.constant 0 : index
    %0 = vector.load %arg1[%c0, %c0_0] : memref<64x112xf32, #tpu.memory_space<vmem>>, vector<64x112xf32>
    %c0_1 = arith.constant 0 : index
    %c0_2 = arith.constant 0 : index
    %1 = vector.load %arg2[%c0_1, %c0_2] : memref<112x96xf32, #tpu.memory_space<vmem>>, vector<112x96xf32>
    %cst = arith.constant dense<0.000000e+00> : vector<64x96xf32>
    %2 = tpu.matmul %0, %1, %cst {dimension_numbers = #tpu.dot_dimension_numbers<[1], [0], [0], [1], [0, 0, 1, 1], [], []>} : vector<64x112xf32>, vector<112x96xf32>, vector<64x96xf32> -> vector<64x96xf32>
    %cst_3 = arith.constant dense<0.000000e+00> : vector<96xf32>
    %3 = vector.multi_reduction <add>, %2, %cst_3 [0] : vector<64x96xf32> to vector<96xf32>
    %4 = vector.shape_cast %3 : vector<96xf32> to vector<1x96xf32>
    %cst_4 = arith.constant 6.400000e+01 : f32
    %5 = vector.broadcast %cst_4 : f32 to vector<1x96xf32>
    %6 = arith.divf %4, %5 : vector<1x96xf32>
    %7 = vector.broadcast %6 : vector<1x96xf32> to vector<64x96xf32>
    %8 = arith.subf %2, %7 : vector<64x96xf32>
    %9 = arith.mulf %8, %8 : vector<64x96xf32>
    %cst_5 = arith.constant dense<0.000000e+00> : vector<96xf32>
    %10 = vector.multi_reduction <add>, %9, %cst_5 [0] : vector<64x96xf32> to vector<96xf32>
    %11 = vector.shape_cast %10 : vector<96xf32> to vector<1x96xf32>
    %cst_6 = arith.constant 6.400000e+01 : f32
    %12 = vector.broadcast %cst_6 : f32 to vector<1x96xf32>
    %13 = arith.divf %11, %12 : vector<1x96xf32>
    %c0_7 = arith.constant 0 : index
    %c0_8 = arith.constant 0 : index
    %14 = vector.load %arg3[%c0_7, %c0_8] : memref<2x96xf32, #tpu.memory_space<vmem>>, vector<1x96xf32>
    %c1 = arith.constant 1 : index
    %c0_9 = arith.constant 0 : index
    %15 = vector.load %arg3[%c1, %c0_9] : memref<2x96xf32, #tpu.memory_space<vmem>>, vector<1x96xf32>
    %16 = vector.broadcast %6 : vector<1x96xf32> to vector<64x96xf32>
    %17 = arith.subf %2, %16 : vector<64x96xf32>
    %cst_10 = arith.constant 9.99999974E-6 : f32
    %18 = vector.broadcast %cst_10 : f32 to vector<1x96xf32>
    %19 = arith.addf %13, %18 : vector<1x96xf32>
    %20 = math.rsqrt %19 : vector<1x96xf32>
    %21 = vector.broadcast %20 : vector<1x96xf32> to vector<64x96xf32>
    %22 = arith.mulf %17, %21 : vector<64x96xf32>
    %23 = vector.broadcast %14 : vector<1x96xf32> to vector<64x96xf32>
    %24 = arith.mulf %22, %23 : vector<64x96xf32>
    %25 = vector.broadcast %15 : vector<1x96xf32> to vector<64x96xf32>
    %26 = arith.addf %24, %25 : vector<64x96xf32>
    %c0_11 = arith.constant 0 : index
    %c0_12 = arith.constant 0 : index
    %27 = vector.load %arg4[%c0_11, %c0_12] : memref<64x96xf32, #tpu.memory_space<vmem>>, vector<64x96xf32>
    %28 = arith.mulf %26, %27 : vector<64x96xf32>
    %29 = vector.extract_strided_slice %28 {offsets = [0, 0], sizes = [64, 32], strides = [1, 1]} : vector<64x96xf32> to vector<64x32xf32>
    %30 = vector.extract_strided_slice %28 {offsets = [0, 32], sizes = [64, 32], strides = [1, 1]} : vector<64x96xf32> to vector<64x32xf32>
    %31 = arith.addf %29, %30 : vector<64x32xf32>
    %32 = vector.extract_strided_slice %28 {offsets = [0, 64], sizes = [64, 32], strides = [1, 1]} : vector<64x96xf32> to vector<64x32xf32>
    %33 = arith.addf %31, %32 : vector<64x32xf32>
    %c0_13 = arith.constant 0 : index
    %c0_14 = arith.constant 0 : index
    %34 = vector.load %arg0[%c0_13, %c0_14] : memref<8x1xi32, #tpu.memory_space<vmem>>, vector<8x1xi32>
    %35 = tpu.iota {dimensions = array<i32: 1>} : vector<8x64xi32>
    %36 = vector.broadcast %34 : vector<8x1xi32> to vector<8x64xi32>
    %37 = arith.cmpi eq, %35, %36 : vector<8x64xi32>
    %38 = arith.extui %37 : vector<8x64xi1> to vector<8x64xi32>
    %39 = arith.sitofp %38 : vector<8x64xi32> to vector<8x64xf32>
    %cst_15 = arith.constant dense<0.000000e+00> : vector<8x32xf32>
    %40 = tpu.matmul %39, %33, %cst_15 {dimension_numbers = #tpu.dot_dimension_numbers<[1], [0], [0], [1], [0, 0, 1, 1], [], []>} : vector<8x64xf32>, vector<64x32xf32>, vector<8x32xf32> -> vector<8x32xf32>
    %c0_16 = arith.constant 0 : index
    %c0_17 = arith.constant 0 : index
    %41 = vector.load %arg5[%c0_16, %c0_17] : memref<8x32xf32, #tpu.memory_space<vmem>>, vector<8x32xf32>
    tpu.vector_store %arg5[%c0_16, %c0_17], %40 {strides = array<i32>} : memref<8x32xf32, #tpu.memory_space<vmem>>, vector<8x32xf32>,
    return
  }
}

</mosaic_0001>

<bundles_post_ra>
// kernel: autodim_embedding.1
= control target key start
LH: loop header
LB: loop body
LE: loop exit
PB: predicated region body
PF: predicated region fallthrough
CT: control target
= control target key end

     0   :  { %s645_s0 = inlined_call_operand.vmem [shape: s32[8,1], index: 0, kind: input, shape index: {}]   ;;  %s646_s1 = inlined_call_operand.vmem [shape: f32[64,112], index: 1, kind: input, shape index: {}]   ;;  %s647_s2 = inlined_call_operand.vmem [shape: f32[112,96], index: 2, kind: input, shape index: {}]   ;;  %s648_s3 = inlined_call_operand.vmem [shape: f32[2,96], index: 3, kind: input, shape index: {}]   ;;  %s649_s4 = inlined_call_operand.vmem [shape: f32[64,96], index: 4, kind: input, shape index: {}]   ;;  %s650_s5 = inlined_call_operand.hbm [shape: f32[8,32], index: 5, kind: output, shape index: {}]  }
   0x1   :  { %v42_v0 = vld [vmem:[%s647_s2 + $0x68] sm:$0xff]  ;;  %v41_v1 = vld [vmem:[%s647_s2 + $0x60] sm:$0xff]  ;;  %v40_v2 = vld [vmem:[%s647_s2 + $0x58] sm:$0xff] }
   0x2   :  { %365 = vmatpush.msra.mxu1 %v42_v0  ;;  %366 = vmatpush.msra.mxu2 %v42_v0  ;;  %v39_v3 = vld [vmem:[%s647_s2 + $0x50] sm:$0xff]  ;;  %v38_v4 = vld [vmem:[%s647_s2 + $0x48] sm:$0xff]  ;;  %v37_v5 = vld [vmem:[%s647_s2 + $0x40] sm:$0xff] }
   0x3   :  { %367 = vmatpush.msra.mxu3 %v42_v0  ;;  %70 = vmatpush.msra.mxu0 %v42_v0 }
   0x4   :  { %368 = vmatpush.msra.mxu1 %v41_v1  ;;  %369 = vmatpush.msra.mxu2 %v41_v1 }
   0x5   :  { %370 = vmatpush.msra.mxu3 %v41_v1  ;;  %71 = vmatpush.msra.mxu0 %v41_v1 }
   0x6   :  { %371 = vmatpush.msra.mxu1 %v40_v2  ;;  %372 = vmatpush.msra.mxu2 %v40_v2 }
   0x7   :  { %373 = vmatpush.msra.mxu3 %v40_v2  ;;  %72 = vmatpush.msra.mxu0 %v40_v2 }
   0x8   :  { %374 = vmatpush.msra.mxu1 %v39_v3  ;;  %375 = vmatpush.msra.mxu2 %v39_v3 }
   0x9   :  { %376 = vmatpush.msra.mxu3 %v39_v3  ;;  %73 = vmatpush.msra.mxu0 %v39_v3 }
   0xa   :  { %10 = vsyncpa [#allocation3], 0  ;;  %377 = vmatpush.msra.mxu1 %v38_v4  ;;  %378 = vmatpush.msra.mxu2 %v38_v4  ;;  %v36_v6 = vld [vmem:[%s647_s2 + $0x38] sm:$0xff]  ;;  %v35_v7 = vld [vmem:[%s647_s2 + $0x30] sm:$0xff]  ;;  %vm43_vm0 = vcmask 916480   ;;  %vm109_vm1 = vcmask 785408  }
   0xb   :  { %379 = vmatpush.msra.mxu3 %v38_v4  ;;  %74 = vmatpush.msra.mxu0 %v38_v4  ;;  %v34_v8 = vld [vmem:[%s647_s2 + $0x28] sm:$0xff]  ;;  %v33_v9 = vld [vmem:[%s647_s2 + $0x20] sm:$0xff]  ;;  %v32_v10 = vld [vmem:[%s647_s2 + $0x18] sm:$0xff]  ;;  %v447_v32 = vmov 64.0   ;;  %s449_s18 = smov 96   ;;  %vm313_vm7 = vcmask 523264  }
   0xc   :  { %380 = vmatpush.msra.mxu1 %v37_v5  ;;  %381 = vmatpush.msra.mxu2 %v37_v5  ;;  %v31_v11 = vld [vmem:[%s647_s2 + $0x10] sm:$0xff]  ;;  %v30_v12 = vld [vmem:[%s647_s2 + $0x8] sm:$0xff]  ;;  %v29_v13 = vld [vmem:[%s647_s2] sm:$0xff]  ;;  %417 = vrcp.f32 %v447_v32  ;;  %s346_s9 = sshll.u32 %s650_s5, 4  ;;  %vm337_vm8 = vcmask 261120   ;;  %s347_s9 = int_to_ptr.hbm [resolvable:$true] %s346_s9 }
   0xd   :  { %382 = vmatpush.msra.mxu3 %v37_v5  ;;  %75 = vmatpush.msra.mxu0 %v37_v5  ;;  %v22_v14 = vld [vmem:[%s646_s1 + $0x8] sm:$0xff]  ;;  %v24_v15 = vld [vmem:[%s646_s1 + $0x18] sm:$0xff]  ;;  %v21_v17 = vld [vmem:[%s646_s1] sm:$0xff] }
   0xe   :  { %383 = vmatpush.msra.mxu1 %v36_v6  ;;  %384 = vmatpush.msra.mxu2 %v36_v6  ;;  %v26_v16 = vld [vmem:[%s646_s1 + $0x28] sm:$0xff]  ;;  %v23_v18 = vld [vmem:[%s646_s1 + $0x10] sm:$0xff]  ;;  %v25_v19 = vld [vmem:[%s646_s1 + $0x20] sm:$0xff] }
   0xf   :  { %385 = vmatpush.msra.mxu3 %v36_v6  ;;  %76 = vmatpush.msra.mxu0 %v36_v6  ;;  %v27_v20 = vld [vmem:[%s646_s1 + $0x30] sm:$0xff]  ;;  %v28_v21 = vld [vmem:[%s646_s1 + $0x38] sm:$0xff] }
  0x10   :  { %386 = vmatpush.msra.mxu1 %v35_v7  ;;  %387 = vmatpush.msra.mxu2 %v35_v7 }
  0x11   :  { %388 = vmatpush.msra.mxu3 %v35_v7  ;;  %77 = vmatpush.msra.mxu0 %v35_v7 }
  0x12   :  { %389 = vmatpush.msra.mxu1 %v34_v8  ;;  %390 = vmatpush.msra.mxu2 %v34_v8  ;;  %v418_v38 = vpop.eup %417 }
  0x13   :  { %391 = vmatpush.msra.mxu3 %v34_v8  ;;  %78 = vmatpush.msra.mxu0 %v34_v8  ;;  %v132_v42 = vmul.f32 64.0, %v418_v38  ;;  %vm136_vm2 = vweird.f32 %v418_v38 }
  0x14   :  { %392 = vmatpush.msra.mxu1 %v33_v9  ;;  %393 = vmatpush.msra.mxu2 %v33_v9 }
  0x15   :  { %394 = vmatpush.msra.mxu3 %v33_v9  ;;  %79 = vmatpush.msra.mxu0 %v33_v9  ;;  %v133_v47 = vsub.f32 1.0, %v132_v42 }
  0x16   :  { %395 = vmatpush.msra.mxu1 %v32_v10  ;;  %396 = vmatpush.msra.mxu2 %v32_v10 }
  0x17   :  { %397 = vmatpush.msra.mxu3 %v32_v10  ;;  %80 = vmatpush.msra.mxu0 %v32_v10  ;;  %v134_v50 = vmul.f32 %v418_v38, %v133_v47 }
  0x18   :  { %398 = vmatpush.msra.mxu1 %v31_v11  ;;  %399 = vmatpush.msra.mxu2 %v31_v11 }
  0x19   :  { %400 = vmatpush.msra.mxu3 %v31_v11  ;;  %81 = vmatpush.msra.mxu0 %v31_v11  ;;  %v135_v53 = vadd.f32 %v418_v38, %v134_v50 }
  0x1a   :  { %401 = vmatpush.msra.mxu1 %v30_v12  ;;  %402 = vmatpush.msra.mxu2 %v30_v12 }
  0x1b   :  { %403 = vmatpush.msra.mxu3 %v30_v12  ;;  %82 = vmatpush.msra.mxu0 %v30_v12  ;;  %v137_v56 = vsel %vm136_vm2, %v418_v38, %v135_v53 }
  0x1c   :  { %404 = vmatpush.msra.mxu1 %v29_v13  ;;  %405 = vmatpush.msra.mxu2 %v29_v13 }
  0x1d   :  { %406 = vmatpush.msra.mxu3 %v29_v13  ;;  %356 = vmatmul.msk.f32.vlgmr.msra.gmra.mxu1 %vm43_vm0, %v22_v14 }
  0x1e   :  { %358 = vmatmul.msk.f32.vlgmr.msra.gmra.mxu2 %vm43_vm0, %v24_v15  ;;  %360 = vmatmul.msk.f32.vlgmr.msra.gmra.mxu3 %vm43_vm0, %v26_v16 }
  0x1f   :  { %83 = vmatpush.msra.mxu0 %v29_v13 }
  0x20   :  { %355 = vmatmul.msk.f32.vlgmr.msra.gmra.mxu0 %vm43_vm0, %v21_v17 }
  0x25   :  { %357 = vmatmul.msk.f32.gmra.mxu1 %vm43_vm0, %v23_v18 }
  0x26   :  { %359 = vmatmul.msk.f32.gmra.mxu2 %vm43_vm0, %v25_v19  ;;  %361 = vmatmul.msk.f32.gmra.mxu3 %vm43_vm0, %v27_v20 }
  0x2e   :  { %362 = vmatmul.msk.f32.gmra.mxu3 %vm43_vm0, %v28_v21 }
  0x9a   :  { %v88_v22 = vpop.f32.mrf.mxu1 }
  0x9b   :  { %v111_v24 = vsel %vm109_vm1, %v88_v22, 0.0 }
  0x9d   :  { %v85_v23 = vpop.f32.mrf.mxu0 }
  0x9e   :  { %v110_v25 = vsel %vm109_vm1, %v85_v23, 0.0 }
  0x9f   :  { %v112_v29 = vadd.f32 %v111_v24, %v110_v25 }
  0xa1   :  { %v94_v26 = vpop.f32.mrf.mxu2  ;;  %v100_v27 = vpop.f32.mrf.mxu3 }
  0xa2   :  { %v91_v28 = vpop.f32.mrf.mxu1  ;;  %v115_v33 = vsel %vm109_vm1, %v94_v26, 0.0  ;;  %v119_v40 = vsel %vm109_vm1, %v100_v27, 0.0 }
  0xa3   :  { %v113_v30 = vsel %vm109_vm1, %v91_v28, 0.0 }
  0xa4   :  { %v114_v31 = vadd.f32 %v113_v30, %v112_v29 }
  0xa6   :  { %v116_v35 = vadd.f32 %v115_v33, %v114_v31 }
  0xa9   :  { %v97_v34 = vpop.f32.mrf.mxu2  ;;  %v103_v36 = vpop.f32.mrf.mxu3 }
  0xaa   :  { %v117_v37 = vsel %vm109_vm1, %v97_v34, 0.0  ;;  %v121_v43 = vsel %vm109_vm1, %v103_v36, 0.0 }
  0xab   :  { %v118_v39 = vadd.f32 %v117_v37, %v116_v35 }
  0xad   :  { %v120_v41 = vadd.f32 %v119_v40, %v118_v39  ;;  %v415_v40 = vld [vmem:[%s648_s3] ss:$0 sm:$0xff] }
  0xaf   :  { %v122_v44 = vadd.f32 %v121_v43, %v120_v41  ;;  %v416_v43 = vld [vmem:[%s648_s3 + $0x1] ss:$0 sm:$0xff]  ;;  %s448_s3 = smov 64  }
  0xb1   :  { %v106_v45 = vpop.f32.mrf.mxu3 }
  0xb2   :  { %v123_v46 = vsel %vm109_vm1, %v106_v45, 0.0 }
  0xb3   :  { %v124_v48 = vadd.f32 %v123_v46, %v122_v44 }
  0xb5   :  { %v125_v49 = vrot.slane %v124_v48, 4 }
  0xb7   :  { %v126_v51 = vadd.f32 %v125_v49, %v124_v48  ;;  %v223_v48 = vld [vmem:[%s649_s4 + $0x38] sm:$0xff]  ;;  %v222_v49 = vld [vmem:[%s649_s4 + $0x30] sm:$0xff] }
  0xb9   :  { %v127_v52 = vrot.slane %v126_v51, 2 }
  0xbb   :  { %v128_v54 = vadd.f32 %v127_v52, %v126_v51 }
  0xbd   :  { %v129_v55 = vrot.slane %v128_v54, 1 }
  0xbf   :  { %v130_v57 = vadd.f32 %v129_v55, %v128_v54 }
  0xc1   :  { %v138_v58 = vmul.f32 %v137_v56, %v130_v57 }
  0xc3   :  { %v565_v59 = vsub.f32 %v85_v23, %v138_v58  ;;  %v567_v60 = vsub.f32 %v88_v22, %v138_v58  ;;  %v569_v61 = vsub.f32 %v91_v28, %v138_v58  ;;  %v571_v62 = vsub.f32 %v94_v26, %v138_v58 }
  0xc4   :  { %v143_v63 = vsub.f32 %v97_v34, %v138_v58  ;;  %v144_v3 = vsub.f32 %v100_v27, %v138_v58  ;;  %v145_v8 = vsub.f32 %v103_v36, %v138_v58  ;;  %v146_v12 = vsub.f32 %v106_v45, %v138_v58 }
  0xc5   :  { %v147_v0 = vmul.f32 %v565_v59, %v565_v59  ;;  %v148_v1 = vmul.f32 %v567_v60, %v567_v60  ;;  %v149_v2 = vmul.f32 %v569_v61, %v569_v61  ;;  %v150_v4 = vmul.f32 %v571_v62, %v571_v62 }
  0xc6   :  { %v151_v9 = vmul.f32 %v143_v63, %v143_v63  ;;  %v152_v13 = vmul.f32 %v144_v3, %v144_v3  ;;  %v153_v16 = vmul.f32 %v145_v8, %v145_v8  ;;  %v154_v19 = vmul.f32 %v146_v12, %v146_v12 }
  0xc7   :  { %v155_v5 = vsel %vm109_vm1, %v147_v0, 0.0  ;;  %v156_v6 = vsel %vm109_vm1, %v148_v1, 0.0  ;;  %v158_v10 = vsel %vm109_vm1, %v149_v2, 0.0  ;;  %v160_v14 = vsel %vm109_vm1, %v150_v4, 0.0  ;;  %v220_v1 = vld [vmem:[%s649_s4 + $0x20] sm:$0xff] }
  0xc8   :  { %v157_v7 = vadd.f32 %v156_v6, %v155_v5  ;;  %v162_v17 = vsel %vm109_vm1, %v151_v9, 0.0  ;;  %v164_v20 = vsel %vm109_vm1, %v152_v13, 0.0  ;;  %v166_v22 = vsel %vm109_vm1, %v153_v16, 0.0 }
  0xc9   :  { %v168_v24 = vsel %vm109_vm1, %v154_v19, 0.0  ;;  %v450_v5 = vmov 0  }
  0xca   :  { %v159_v11 = vadd.f32 %v158_v10, %v157_v7  ;;  %413 = vset.pattern.permute.xlu1 %v450_v5  ;;  %414 = vset.pattern.permute.xlu0 %v450_v5  ;;  %v219_v7 = vld [vmem:[%s649_s4 + $0x18] sm:$0xff] }
  0xcc   :  { %v161_v15 = vadd.f32 %v160_v14, %v159_v11 }
  0xce   :  { %v163_v18 = vadd.f32 %v162_v17, %v161_v15 }
  0xd0   :  { %v165_v21 = vadd.f32 %v164_v20, %v163_v18  ;;  %v304_v20 = vld [vmem:[%s645_s0] sm:$0xff]  ;;  %s452_s0 = smov [#allocation2]  }
  0xd2   :  { %v167_v23 = vadd.f32 %v166_v22, %v165_v21 }
  0xd4   :  { %v169_v25 = vadd.f32 %v168_v24, %v167_v23 }
  0xd6   :  { %v170_v26 = vrot.slane %v169_v25, 4 }
  0xd8   :  { %v171_v27 = vadd.f32 %v170_v26, %v169_v25 }
  0xda   :  { %v172_v28 = vrot.slane %v171_v27, 2 }
  0xdc   :  { %v173_v29 = vadd.f32 %v172_v28, %v171_v27 }
  0xde   :  { %v174_v30 = vrot.slane %v173_v29, 1 }
  0xe0   :  { %v175_v31 = vadd.f32 %v174_v30, %v173_v29 }
  0xe2   :  { %v176_v32 = vmul.f32 %v175_v31, %v137_v56 }
  0xe4   :  { %v179_v33 = vadd.f32 1e-05, %v176_v32 }
  0xe6   :  { %419 = vrsqrt.f32 %v179_v33  ;;  %vm186_vm4 = vweird.f32 %v179_v33 }
  0xec   :  { %v420_v34 = vpop.eup %419 }
  0xed   :  { %v181_v35 = vmul.f32 %v420_v34, %v179_v33  ;;  %vm187_vm3 = vweird.f32 %v420_v34 }
  0xee   :  { %vm188_vm5 = vmor %vm186_vm4, %vm187_vm3 }
  0xef   :  { %v182_v36 = vmul.f32 %v420_v34, %v181_v35 }
  0xf1   :  { %v183_v37 = vmul.f32 0.5, %v182_v36 }
  0xf3   :  { %v184_v38 = vsub.f32 1.5, %v183_v37 }
  0xf5   :  { %v185_v39 = vmul.f32 %v420_v34, %v184_v38 }
  0xf7   :  { %v189_v41 = vsel %vm188_vm5, %v420_v34, %v185_v39 }
  0xf8   :  { %v197_v42 = vmul.f32 %v189_v41, %v146_v12  ;;  %v196_v44 = vmul.f32 %v189_v41, %v145_v8  ;;  %v195_v47 = vmul.f32 %v189_v41, %v144_v3  ;;  %v194_v50 = vmul.f32 %v189_v41, %v143_v63  ;;  %v221_v63 = vld [vmem:[%s649_s4 + $0x28] sm:$0xff] }
  0xf9   :  { %v193_v58 = vmul.f32 %v189_v41, %v571_v62  ;;  %v192_v6 = vmul.f32 %v189_v41, %v569_v61  ;;  %v191_v8 = vmul.f32 %v189_v41, %v567_v60  ;;  %v190_v13 = vmul.f32 %v189_v41, %v565_v59  ;;  %v218_v61 = vld [vmem:[%s649_s4 + $0x10] sm:$0xff]  ;;  %v217_v60 = vld [vmem:[%s649_s4 + $0x8] sm:$0xff]  ;;  %v216_v59 = vld [vmem:[%s649_s4] sm:$0xff]  ;;  %s344_s4 = sshll.u32 %s452_s0, 4  ;;  %s345_s4 = int_to_ptr.vmem [resolvable:$true] %s344_s4 }
  0xfa   :  { %v206_v45 = vmul.f32 %v415_v40, %v197_v42  ;;  %v205_v46 = vmul.f32 %v415_v40, %v196_v44  ;;  %v204_v55 = vmul.f32 %v415_v40, %v195_v47  ;;  %v203_v56 = vmul.f32 %v415_v40, %v194_v50 }
  0xfb   :  { %v202_v3 = vmul.f32 %v415_v40, %v193_v58  ;;  %v201_v10 = vmul.f32 %v415_v40, %v192_v6  ;;  %v200_v11 = vmul.f32 %v415_v40, %v191_v8  ;;  %v199_v16 = vmul.f32 %v415_v40, %v190_v13 }
  0xfc   :  { %v215_v51 = vadd.f32 %v416_v43, %v206_v45  ;;  %v214_v52 = vadd.f32 %v416_v43, %v205_v46  ;;  %v213_v57 = vadd.f32 %v416_v43, %v204_v55  ;;  %v212_v0 = vadd.f32 %v416_v43, %v203_v56 }
  0xfd   :  { %v211_v62 = vadd.f32 %v416_v43, %v202_v3  ;;  %v210_v12 = vadd.f32 %v416_v43, %v201_v10  ;;  %v209_v14 = vadd.f32 %v416_v43, %v200_v11  ;;  %v208_v18 = vadd.f32 %v416_v43, %v199_v16 }
  0xfe   :  { %v231_v53 = vmul.f32 %v223_v48, %v215_v51  ;;  %v230_v54 = vmul.f32 %v222_v49, %v214_v52  ;;  %v229_v2 = vmul.f32 %v221_v63, %v213_v57  ;;  %v228_v4 = vmul.f32 %v220_v1, %v212_v0 }
  0xff   :  { %v227_v9 = vmul.f32 %v219_v7, %v211_v62  ;;  %v226_v15 = vmul.f32 %v218_v61, %v210_v12  ;;  %v225_v17 = vmul.f32 %v217_v60, %v209_v14  ;;  %v224_v19 = vmul.f32 %v216_v59, %v208_v18 }
 0x100   :  { %286 = vrot.lane.b32.xlu1 %v231_v53, %s448_s3  ;;  %254 = vrot.lane.b32.xlu0 %v231_v53, %s449_s18  ;;  %v305_v49 = vlaneseq  ;;  %v451_v56 = vmov 0.0  }
 0x101   :  { %284 = vrot.lane.b32.xlu2 %v230_v54, %s448_s3 }
 0x102   :  { %v306_v51 = vand.u32 127, %v305_v49 }
 0x108   :  { %252 = vrot.lane.b32.xlu0 %v230_v54, %s449_s18  ;;  %250 = vrot.lane.b32.xlu1 %v229_v2, %s449_s18 }
 0x109   :  { %248 = vrot.lane.b32.xlu2 %v228_v4, %s449_s18 }
 0x110   :  { %282 = vrot.lane.b32.xlu0 %v229_v2, %s448_s3  ;;  %246 = vrot.lane.b32.xlu1 %v227_v9, %s449_s18 }
 0x111   :  { %280 = vrot.lane.b32.xlu2 %v228_v4, %s448_s3 }
 0x118   :  { %278 = vrot.lane.b32.xlu1 %v227_v9, %s448_s3  ;;  %244 = vrot.lane.b32.xlu0 %v226_v15, %s449_s18 }
 0x119   :  { %242 = vrot.lane.b32.xlu2 %v225_v17, %s449_s18 }
 0x120   :  { %276 = vrot.lane.b32.xlu0 %v226_v15, %s448_s3  ;;  %240 = vrot.lane.b32.xlu1 %v224_v19, %s449_s18 }
 0x121   :  { %274 = vrot.lane.b32.xlu2 %v225_v17, %s448_s3 }
 0x128   :  { %272 = vrot.lane.b32.xlu0 %v224_v19, %s448_s3  ;;  %308 = vperm.xlu1 %413, %v304_v20  }
 0x15b   :  { %v285_v21 = vpop.permute.xlu2 %284 }
 0x163   :  { %v249_v24 = vpop.permute.xlu2 %248 }
 0x164   :  { %v268_v35 = vadd.f32 %v249_v24, %v228_v4 }
 0x16b   :  { %v281_v30 = vpop.permute.xlu2 %280 }
 0x16c   :  { %v300_v37 = vadd.f32 %v281_v30, %v268_v35 }
 0x172   :  { %v287_v22 = vpop.permute.xlu1 %286  ;;  %v255_v23 = vpop.permute.xlu0 %254 }
 0x173   :  { %v271_v25 = vadd.f32 %v255_v23, %v231_v53  ;;  %v243_v38 = vpop.permute.xlu2 %242 }
 0x174   :  { %v265_v47 = vadd.f32 %v243_v38, %v225_v17 }
 0x175   :  { %v303_v26 = vadd.f32 %v287_v22, %v271_v25 }
 0x177   :  { %325 = vmatpush.msrb.mxu1 %v303_v26 }
 0x17a   :  { %v253_v27 = vpop.permute.xlu0 %252  ;;  %v251_v28 = vpop.permute.xlu1 %250 }
 0x17b   :  { %v270_v29 = vadd.f32 %v253_v27, %v230_v54  ;;  %v269_v32 = vadd.f32 %v251_v28, %v229_v2  ;;  %v275_v43 = vpop.permute.xlu2 %274 }
 0x17c   :  { %v297_v50 = vadd.f32 %v275_v43, %v265_v47 }
 0x17d   :  { %v302_v31 = vadd.f32 %v285_v21, %v270_v29 }
 0x17f   :  { %326 = vmatpush.msrb.mxu1 %v302_v31 }
 0x182   :  { %v283_v33 = vpop.permute.xlu0 %282  ;;  %v247_v34 = vpop.permute.xlu1 %246 }
 0x183   :  { %v301_v36 = vadd.f32 %v283_v33, %v269_v32  ;;  %v267_v39 = vadd.f32 %v247_v34, %v227_v9 }
 0x185   :  { %327 = vmatpush.msrb.mxu1 %v301_v36 }
 0x187   :  { %328 = vmatpush.msrb.mxu1 %v300_v37 }
 0x18a   :  { %v279_v40 = vpop.permute.xlu1 %278  ;;  %v245_v41 = vpop.permute.xlu0 %244 }
 0x18b   :  { %v299_v42 = vadd.f32 %v279_v40, %v267_v39  ;;  %v266_v44 = vadd.f32 %v245_v41, %v226_v15 }
 0x18d   :  { %329 = vmatpush.msrb.mxu1 %v299_v42 }
 0x192   :  { %v277_v45 = vpop.permute.xlu0 %276  ;;  %v241_v46 = vpop.permute.xlu1 %240 }
 0x193   :  { %v298_v48 = vadd.f32 %v277_v45, %v266_v44  ;;  %v264_v52 = vadd.f32 %v241_v46, %v224_v19 }
 0x195   :  { %330 = vmatpush.msrb.mxu1 %v298_v48 }
 0x197   :  { %331 = vmatpush.msrb.mxu1 %v297_v50 }
 0x19a   :  { %v273_v53 = vpop.permute.xlu0 %272  ;;  %v309_v54 = vpop.permute.xlu1 %308 }
 0x19b   :  { %v296_v55 = vadd.f32 %v273_v53, %v264_v52  ;;  %vm310_vm6 = vcmp.eq.s32.totalorder %v306_v51, %v309_v54 }
 0x19c   :  { %v363_v57 = vsel %vm310_vm6, 1.0, %v451_v56 }
 0x19d   :  { %332 = vmatpush.msrb.mxu1 %v296_v55 }
 0x19e   :  { %364 = vmatmul.msk.f32.vlgmr.msrb.gmra.mxu1 %vm313_vm7, %v363_v57 }
 0x21b   :  { %v334_v58 = vpop.f32.mrf.mxu1 }
 0x21c   :  { %338 = vst.msk [vmem:[#allocation2] sm:$0xff] %vm337_vm8, %v334_v58 }
 0x21d   :  { %349 = dma.vmem_to_hbm [thread:$0]  %s345_s4, 128, %s347_s9, [#allocation3]  }
 0x21e   :  { %445 = dma.done.wait [#allocation3], 128  }
 0x21f   :  { %446 = vsyncadd [#allocation3], 4294967168 }
 0x220   :  { %354 = vsyncpa [#allocation3], 1 }

</bundles_post_ra>
